<compile_context>
chip_gen: v7x
topology: tpu7x:2x2x1
jax: 0.10.0
libtpu: 0.0.40
codegen_flags: <defaults>
</compile_context>

<pallas_src>
import numpy as np
import jax
import jax.numpy as jnp
from jax.experimental import pallas as pl
from jax.experimental.pallas import tpu as pltpu


# ---------------------------------------------------------------------------
# Kernel body (shared by both layouts): one resident-weight GEMM + bias.
#   w_ref   : [P, L]  fused weight W_eff = Ws + (Wt - Ws) @ A   (resident)
#   x_ref   : [L, T]  input tile (T = folded B*C lanes, or a channel tile)
#   bias_ref: [P, 1]  combined bias (bs + bt)                    (resident)
#   o_ref   : [P, T]
# ---------------------------------------------------------------------------
def dlinear_kernel(w_ref, x_ref, bias_ref, o_ref):
    x = x_ref[...].astype(w_ref.dtype)        # no-op when dtypes already match
    acc = jnp.dot(w_ref[...], x, preferred_element_type=jnp.float32)
    o_ref[...] = (acc + bias_ref[...]).astype(o_ref.dtype)


# ---------------------------------------------------------------------------
# Wrapper helpers
# ---------------------------------------------------------------------------
def _round_up(v, m):
    return ((v + m - 1) // m) * m


def _pick_tile_units(n_units, cap_units):
    """Largest divisor of n_units that is <= cap_units; when n_units >= 2,
    additionally require >= 2 grid steps so v7x's two TensorCores both get
    work (zero cost on single-TC v5e/v6e)."""
    best = 1
    for d in range(min(n_units, cap_units), 0, -1):
        if n_units % d == 0:
            if n_units >= 2 and n_units // d < 2:
                continue
            best = d
            break
    return best


def _compiler_params(dimension_semantics, vmem_need_bytes):
    kwargs = dict(dimension_semantics=dimension_semantics)
    # Only raise the scoped VMEM limit when the double-buffered working set
    # actually needs it (keeps the v7x 64 MiB-physical / 32 MiB-scoped budget
    # safe while letting v5e/v6e use big tiles too).
    if vmem_need_bytes > 16 * 1024 * 1024:
        kwargs["vmem_limit_bytes"] = min(2 * vmem_need_bytes, 96 * 1024 * 1024)
    return pltpu.CompilerParams(**kwargs)


def fuse_dlinear_params(avg_mat, w_s, w_t, b_s, b_t,
                        *, compute_dtype=jnp.bfloat16):
    """Precompute the fused parameters ONCE per parameter set (init-time /
    cached), not per forward call:
        W_eff = Ws + (Wt - Ws) @ A      (exact for shared weights)
        bias  = bs + bt
    """
    w_eff = (w_s + jnp.dot(w_t - w_s, avg_mat)).astype(compute_dtype)   # [P, L]
    bias = (b_s + b_t).reshape(-1, 1).astype(jnp.float32)               # [P, 1]
    return w_eff, bias


def dlinear_forward(x, w_eff, bias, *, lane_tile=2048, out_dtype=jnp.float32):
    """DLinear forward.  x: [B, L, C]  ->  [B, P, C] (out_dtype)."""
    B, L, C = x.shape
    P = w_eff.shape[0]
    compute_dtype = w_eff.dtype
    in_item = jnp.dtype(compute_dtype).itemsize
    out_item = jnp.dtype(out_dtype).itemsize
    cap_units = max(1, lane_tile // 128)

    if C % 128 == 0:
        # ---------------- native-layout path: zero wrapper HBM passes -------
        c_tile = _pick_tile_units(C // 128, cap_units) * 128
        vmem_need = (2 * (L * c_tile * x.dtype.itemsize + P * c_tile * out_item)
                     + P * L * in_item + P * 4)
        cost = pl.CostEstimate(
            flops=2 * B * P * L * C,
            transcendentals=0,
            bytes_accessed=(B * L * C * x.dtype.itemsize + P * L * in_item
                            + B * P * C * out_item + P * 4))
        return pl.pallas_call(
            dlinear_kernel,
            out_shape=jax.ShapeDtypeStruct((B, P, C), out_dtype),
            grid=(B, C // c_tile),
            in_specs=[
                pl.BlockSpec((P, L), lambda b, c: (0, 0)),              # resident
                pl.BlockSpec((None, L, c_tile), lambda b, c: (b, 0, c)),  # streamed
                pl.BlockSpec((P, 1), lambda b, c: (0, 0)),              # resident
            ],
            out_specs=pl.BlockSpec((None, P, c_tile), lambda b, c: (b, 0, c)),
            compiler_params=_compiler_params(("parallel", "parallel"), vmem_need),
            cost_estimate=cost,
        )(w_eff, x, bias)

    # ---------------- lane-fold path (small / ragged C) ---------------------
    N = B * C
    n128 = _round_up(N, 128)
    tile = _pick_tile_units(n128 // 128, cap_units) * 128
    # Fold batch*channels onto lanes and cast to the streaming dtype in ONE
    # fused XLA pass; pad only to the next 128 multiple (no tile-sized waste).
    x2 = jnp.transpose(x, (1, 0, 2)).reshape(L, N).astype(compute_dtype)
    if n128 != N:
        x2 = jnp.pad(x2, ((0, 0), (0, n128 - N)))

    vmem_need = (2 * (L * tile * in_item + P * tile * out_item)
                 + P * L * in_item + P * 4)
    cost = pl.CostEstimate(
        flops=2 * P * L * n128,
        transcendentals=0,
        bytes_accessed=(L * n128 + P * L) * in_item + P * n128 * out_item + P * 4)

    out2 = pl.pallas_call(
        dlinear_kernel,
        out_shape=jax.ShapeDtypeStruct((P, n128), out_dtype),
        grid=(n128 // tile,),
        in_specs=[
            pl.BlockSpec((P, L), lambda n: (0, 0)),       # W_eff   (resident)
            pl.BlockSpec((L, tile), lambda n: (0, n)),    # x tile  (streamed)
            pl.BlockSpec((P, 1), lambda n: (0, 0)),       # bias    (resident)
        ],
        out_specs=pl.BlockSpec((P, tile), lambda n: (0, n)),
        compiler_params=_compiler_params(("parallel",), vmem_need),
        cost_estimate=cost,
    )(w_eff, x2, bias)

    out = out2[:, :N].reshape(P, B, C)
    return jnp.transpose(out, (1, 0, 2))


# ---------------------------------------------------------------------------
# Decomposition-matrix / parameter construction (plain host-side glue)
# ---------------------------------------------------------------------------
def build_moving_avg_matrix(L, kernel_size):
    """A[i, j] = weight of x[j] in moving-average window i (edge-replicated)."""
    pad = (kernel_size - 1) // 2
    A = np.zeros((L, L), dtype=np.float32)
    for i in range(L):
        for k in range(kernel_size):
            src = min(max(i + k - pad, 0), L - 1)
            A[i, src] += 1.0 / kernel_size
    return jnp.asarray(A)


def init_params_module(seq_len, pred_len, key):
    """Exactly the module's init: weights = ones/seq_len, biases = Linear default."""
    w_s = jnp.full((pred_len, seq_len), 1.0 / seq_len, dtype=jnp.float32)
    w_t = jnp.full((pred_len, seq_len), 1.0 / seq_len, dtype=jnp.float32)
    k1, k2 = jax.random.split(key)
    bound = 1.0 / np.sqrt(seq_len)
    b_s = jax.random.uniform(k1, (pred_len,), jnp.float32, -bound, bound)
    b_t = jax.random.uniform(k2, (pred_len,), jnp.float32, -bound, bound)
    return w_s, w_t, b_s, b_t


def init_params_random(seq_len, pred_len, key):
    """Random weights — exercises the decomposition path of the fusion."""
    k1, k2, k3, k4 = jax.random.split(key, 4)
    w_s = jax.random.normal(k1, (pred_len, seq_len), jnp.float32) * 0.1
    w_t = jax.random.normal(k2, (pred_len, seq_len), jnp.float32) * 0.1
    b_s = jax.random.normal(k3, (pred_len,), jnp.float32) * 0.1
    b_t = jax.random.normal(k4, (pred_len,), jnp.float32) * 0.1
    return w_s, w_t, b_s, b_t


# ---------------------------------------------------------------------------
# Pure-JAX reference (mirrors the PyTorch forward exactly: explicit pad +
# moving average + two shared linears)
# ---------------------------------------------------------------------------
def reference_forward(x, kernel_size, w_s, w_t, b_s, b_t):
    B, L, C = x.shape
    pad = (kernel_size - 1) // 2
    front = jnp.repeat(x[:, :1, :], pad, axis=1)
    end = jnp.repeat(x[:, -1:, :], pad, axis=1)
    xp = jnp.concatenate([front, x, end], axis=1)               # [B, L+2p, C]
    trend = jnp.stack(
        [xp[:, i:i + kernel_size, :].mean(axis=1) for i in range(L)], axis=1)
    seasonal = x - trend
    s = jnp.swapaxes(seasonal, 1, 2)                            # [B, C, L]
    t = jnp.swapaxes(trend, 1, 2)
    out = (s @ w_s.T + b_s) + (t @ w_t.T + b_t)                 # [B, C, P]
    return jnp.swapaxes(out, 1, 2)                              # [B, P, C]


if __name__ == "__main__":
    # Model(seq_len=32, pred_len=16, enc_in=8, moving_avg=25, individual=False)
    B, seq_len, pred_len, moving_avg = 2, 32, 16, 25
    key = jax.random.PRNGKey(0)
    kx1, kx2, kp1, kp2 = jax.random.split(key, 4)
    avg_mat = build_moving_avg_matrix(seq_len, moving_avg)

    # ---- enc_in=8: exercises the lane-fold path -----------------------------
    C_small = 8
    x_small = jax.random.normal(kx1, (B, seq_len, C_small), dtype=jnp.float32)

    # check 1: the module's exact initialization, f32 streaming (tight tol)
    w_s, w_t, b_s, b_t = init_params_module(seq_len, pred_len, kp1)
    w_eff, bias = fuse_dlinear_params(avg_mat, w_s, w_t, b_s, b_t,
                                      compute_dtype=jnp.float32)
    out = jax.block_until_ready(dlinear_forward(x_small, w_eff, bias))
    ref = reference_forward(x_small, moving_avg, w_s, w_t, b_s, b_t)
    assert out.shape == (B, pred_len, C_small)
    np.testing.assert_allclose(np.asarray(out), np.asarray(ref),
                               rtol=1e-5, atol=1e-5)

    # check 2: random weights, f32 streaming (exercises the W_eff fusion)
    w_s, w_t, b_s, b_t = init_params_random(seq_len, pred_len, kp2)
    w_eff32, bias32 = fuse_dlinear_params(avg_mat, w_s, w_t, b_s, b_t,
                                          compute_dtype=jnp.float32)
    out = jax.block_until_ready(dlinear_forward(x_small, w_eff32, bias32))
    ref = reference_forward(x_small, moving_avg, w_s, w_t, b_s, b_t)
    np.testing.assert_allclose(np.asarray(out), np.asarray(ref),
                               rtol=1e-5, atol=1e-5)

    # check 3: default perf config — bf16 streamed operands, f32 accumulation
    w_eff16, bias16 = fuse_dlinear_params(avg_mat, w_s, w_t, b_s, b_t)  # bf16
    out = jax.block_until_ready(dlinear_forward(x_small, w_eff16, bias16))
    np.testing.assert_allclose(np.asarray(out), np.asarray(ref),
                               rtol=3e-2, atol=3e-2)

    # ---- enc_in=128: exercises the native-layout (zero wrapper pass) path ---
    C_big = 128
    x_big = jax.random.normal(kx2, (B, seq_len, C_big), dtype=jnp.float32)
    ref = reference_forward(x_big, moving_avg, w_s, w_t, b_s, b_t)

    out = jax.block_until_ready(dlinear_forward(x_big, w_eff32, bias32))
    assert out.shape == (B, pred_len, C_big)
    np.testing.assert_allclose(np.asarray(out), np.asarray(ref),
                               rtol=1e-5, atol=1e-5)

    out = jax.block_until_ready(dlinear_forward(x_big, w_eff16, bias16))
    np.testing.assert_allclose(np.asarray(out), np.asarray(ref),
                               rtol=3e-2, atol=3e-2)

    print("KERNEL_OK")
</pallas_src>

<mosaic_0001>
module attributes {stable_mosaic.version = 11 : i64} {
  func.func @dlinear_kernel(%arg0: i32, %arg1: memref<16x32xf32, #tpu.memory_space<vmem>>, %arg2: memref<32x128xf32, #tpu.memory_space<vmem>>, %arg3: memref<16x1xf32, #tpu.memory_space<vmem>>, %arg4: memref<16x128xf32, #tpu.memory_space<vmem>>) attributes {dimension_semantics = [#tpu.dimension_semantics<parallel>], iteration_bounds = array<i64: 1>, scalar_prefetch = 0 : i64, scratch_operands = 0 : i64, tpu.core_type = #tpu.core_type<tc>, window_params = [{pipeline_mode = #tpu.pipeline_mode<synchronous>, transform_indices = @transform_0, window_bounds = array<i64: 16, 32>}, {transform_indices = @transform_1, window_bounds = array<i64: 32, 128>}, {pipeline_mode = #tpu.pipeline_mode<synchronous>, transform_indices = @transform_2, window_bounds = array<i64: 16, 1>}, {transform_indices = @transform_3, window_bounds = array<i64: 16, 128>}]} {
    %c0 = arith.constant 0 : index
    %c0_0 = arith.constant 0 : index
    %0 = vector.load %arg2[%c0, %c0_0] : memref<32x128xf32, #tpu.memory_space<vmem>>, vector<32x128xf32>
    %c0_1 = arith.constant 0 : index
    %c0_2 = arith.constant 0 : index
    %1 = vector.load %arg1[%c0_1, %c0_2] : memref<16x32xf32, #tpu.memory_space<vmem>>, vector<16x32xf32>
    %cst = arith.constant dense<0.000000e+00> : vector<16x128xf32>
    %2 = tpu.matmul %1, %0, %cst {dimension_numbers = #tpu.dot_dimension_numbers<[1], [0], [0], [1], [0, 0, 1, 1], [], []>} : vector<16x32xf32>, vector<32x128xf32>, vector<16x128xf32> -> vector<16x128xf32>
    %c0_3 = arith.constant 0 : index
    %c0_4 = arith.constant 0 : index
    %3 = vector.load %arg3[%c0_3, %c0_4] : memref<16x1xf32, #tpu.memory_space<vmem>>, vector<16x1xf32>
    %4 = vector.broadcast %3 : vector<16x1xf32> to vector<16x128xf32>
    %5 = arith.addf %2, %4 : vector<16x128xf32>
    %c0_5 = arith.constant 0 : index
    %c0_6 = arith.constant 0 : index
    %6 = vector.load %arg4[%c0_5, %c0_6] : memref<16x128xf32, #tpu.memory_space<vmem>>, vector<16x128xf32>
    tpu.vector_store %arg4[%c0_5, %c0_6], %5 {strides = array<i32>} : memref<16x128xf32, #tpu.memory_space<vmem>>, vector<16x128xf32>,
    return
  }
  func.func @transform_0(%arg0: i32) -> (i32, i32) {
    %c0_i32 = arith.constant 0 : i32
    %c0_i32_0 = arith.constant 0 : i32
    %c0_i32_1 = arith.constant 0 : i32
    return %c0_i32, %c0_i32_0 : i32, i32
  }
  func.func @transform_1(%arg0: i32) -> (i32, i32) {
    %c0_i32 = arith.constant 0 : i32
    %c0_i32_0 = arith.constant 0 : i32
    return %c0_i32, %arg0 : i32, i32
  }
  func.func @transform_2(%arg0: i32) -> (i32, i32) {
    %c0_i32 = arith.constant 0 : i32
    %c0_i32_0 = arith.constant 0 : i32
    %c0_i32_1 = arith.constant 0 : i32
    return %c0_i32, %c0_i32_0 : i32, i32
  }
  func.func @transform_3(%arg0: i32) -> (i32, i32) {
    %c0_i32 = arith.constant 0 : i32
    %c0_i32_0 = arith.constant 0 : i32
    return %c0_i32, %arg0 : i32, i32
  }
}

</mosaic_0001>

<bundles_post_ra>
// kernel: tpu_custom_call.1
= control target key start
LH: loop header
LB: loop body
LE: loop exit
PB: predicated region body
PF: predicated region fallthrough
CT: control target
= control target key end

     0   :  { %8 = vsyncpa [#allocation3], 0  ;;  %s298_s0 = inlined_call_operand.vmem [shape: f32[16,32], index: 0, kind: input, shape index: {}]   ;;  %s299_s1 = inlined_call_operand.hbm [shape: f32[32,128], index: 1, kind: input, shape index: {}]   ;;  %s300_s2 = inlined_call_operand.vmem [shape: f32[16,1], index: 2, kind: input, shape index: {}]   ;;  %s301_s3 = inlined_call_operand.hbm [shape: f32[16,128], index: 3, kind: output, shape index: {}]  }
   0x1   :  { %9 = vsyncpa [#allocation4], 0  ;;  %s229_s12 = smov [#allocation2]   ;;  %s181_s16 = scalar_lea.hbm %s299_s1, 512 }
   0x2   :  { %s17_s13 = sshll.u32 %s229_s12, 4  ;;  %p182_p0 = scmp.ne.s32.totalorder %s299_s1, %s181_s16  ;;  %s18_s13 = int_to_ptr.vmem [resolvable:$true] %s17_s13 }
   0x3   :  { %p185_p1 = scmp.lt.u32.totalorder %s181_s16, %s299_s1 }
   0x5   :  { %p187_p2 = pnand %p185_p1, %p182_p0 }
   0x7   :  { %190 = shalt.err (!%p187_p2)
}
   0x8   :  { %s191_s21 = scalar_lea.vmem %s18_s13, 512  ;;  %p196_p4 = scmp.lt.s32.totalorder %s18_s13, %s18_s13 }
   0x9   :  { %p192_p3 = scmp.ne.s32.totalorder %s18_s13, %s191_s21  ;;  %p197_p5 = scmp.lt.s32.totalorder %s191_s21, %s191_s21 }
   0xb   :  { %p198_p6 = por %p197_p5, %p196_p4 }
   0xd   :  { %p199_p7 = pnand %p198_p6, %p192_p3 }
   0xf   :  { %202 = shalt.err (!%p199_p7)
}
  0x10   :  { %s230_s22 = smov 128   ;;  %s231_s23 = smov 8  }
  0x11   :  { %23 = dma.hbm_to_vmem [thread:$0]  %s299_s1, 512, %s18_s13, [#allocation3], %s230_s22, %s230_s22, %s231_s23  }
  0x12   :  { %225 = dma.done.wait [#allocation3], 512  }
  0x13   :  { %226 = vsyncadd [#allocation3], 4294966784  ;;  %v232_v0 = vmov 0   ;;  %vm47_vm0 = vcmask 261120   ;;  %v29_v1 = vld [vmem:[#allocation2] sm:$0xff]  ;;  %v30_v2 = vld [vmem:[#allocation2 + $0x8] sm:$0xff] }
  0x14   :  { %180 = vset.pattern.permute.xlu0 %v232_v0  ;;  %v31_v3 = vld [vmem:[#allocation2 + $0x10] sm:$0xff]  ;;  %v167_v4 = vpack.c.bf16 %v30_v2, %v29_v1  ;;  %v32_v5 = vld [vmem:[#allocation2 + $0x18] sm:$0xff]  ;;  %v33_v6 = vld [vmem:[%s298_s0] sm:$0xff]  ;;  %s233_s6 = smov [#allocation5]  }
  0x15   :  { %v171_v7 = vpack.c.bf16 %v32_v5, %v31_v3  ;;  %164 = vmatprep.mubr.msk.f32.mxu0 %vm47_vm0, %v33_v6  ;;  %v35_v8 = vld [vmem:[%s300_s2] sm:$0xff]  ;;  %v36_v9 = vld [vmem:[%s300_s2 + $0x8] sm:$0xff]  ;;  %s136_s7 = sshll.u32 %s233_s6, 4  ;;  %s137_s7 = int_to_ptr.vmem [resolvable:$true] %s136_s7 }
  0x16   :  { %168 = vmatprep.subr.bf16.mxu0 %v167_v4  ;;  %39 = vperm.xlu0 %180, %v35_v8   ;;  %v34_v10 = vld [vmem:[%s298_s0 + $0x8] sm:$0xff]  ;;  %s203_s2 = scalar_lea.vmem %s137_s7, 256  ;;  %p208_p9 = scmp.lt.s32.totalorder %s137_s7, %s137_s7 }
  0x17   :  { %170 = vmatpush3.bf16.msra.mxu0 %v167_v4  ;;  %p204_p8 = scmp.ne.s32.totalorder %s137_s7, %s203_s2  ;;  %p209_p10 = scmp.lt.s32.totalorder %s203_s2, %s203_s2 }
  0x18   :  { %172 = vmatprep.subr.bf16.mxu0 %v171_v7 }
  0x19   :  { %p210_p11 = por %p209_p10, %p208_p9 }
  0x1a   :  { %44 = vperm.xlu0 %180, %v36_v9  }
  0x1b   :  { %174 = vmatpush3.bf16.msra.mxu0 %v171_v7  ;;  %p211_p12 = pnand %p210_p11, %p204_p8 }
  0x1e   :  { %165 = vmatmul.mubr.msk.f32.vlgmr.msra.gmra.mrb[0].mxu0 %vm47_vm0, %v34_v10 }
  0x95   :  { %v40_v11 = vpop.permute.xlu0 %39 }
  0x99   :  { %v45_v12 = vpop.permute.xlu0 %44 }
  0xf1   :  { %v166_v13 = vpop.f32.mrb[0].mxu0 }
  0xf2   :  { %v126_v14 = vadd.f32 %v166_v13, %v45_v12  ;;  %v120_v15 = vpop.f32.mrb[1].mxu0 }
  0xf3   :  { %v121_v16 = vadd.f32 %v120_v15, %v40_v11 }
  0xf4   :  { %130 = vst [vmem:[#allocation5 + $0x8] sm:$0xff] %v126_v14 }
  0xf5   :  { %129 = vst [vmem:[#allocation5] sm:$0xff] %v121_v16 }
  0xf6   :  { %214 = shalt.err (!%p211_p12)
}
  0xf7   :  { %s215_s9 = scalar_lea.hbm %s301_s3, 256 }
  0xf8   :  { %p216_p13 = scmp.ne.s32.totalorder %s301_s3, %s215_s9  ;;  %p219_p0 = scmp.lt.u32.totalorder %s215_s9, %s301_s3 }
  0xfa   :  { %p221_p1 = pnand %p219_p0, %p216_p13 }
  0xfc   :  { %224 = shalt.err (!%p221_p1)
}
  0xfd   :  { %142 = dma.vmem_to_hbm [thread:$0]  %s137_s7, 256, %s301_s3, [#allocation4], %s230_s22, %s230_s22, %s231_s23  }
  0xfe   :  { %227 = dma.done.wait [#allocation4], 256  }
  0xff   :  { %228 = vsyncadd [#allocation4], 4294967040 }
 0x100   :  { %146 = vsyncpa [#allocation3], 1 }
 0x101   :  { %147 = vsyncpa [#allocation4], 1 }

</bundles_post_ra>
